<compile_context>
chip_gen: v7x
topology: tpu7x:2x2x1
jax: 0.10.0
libtpu: 0.0.40
codegen_flags: <defaults>
</compile_context>

<pallas_src>
import jax
import jax.numpy as jnp
import numpy as np
from jax import lax
from jax.experimental import pallas as pl
from jax.experimental.pallas import tpu as pltpu

MAXPOOL_K = 64  # Shrinkage.map = nn.MaxPool1d(kernel_size=64, stride=64)


def shrinkage_kernel(x_ref, p_ref, out_ref):
    TB, C, L = x_ref.shape
    x = x_ref[...]                                   # (TB, C, L) f32
    p = p_ref[...]                                   # (C+1, 4C) packed params

    # ---- unpack the single packed parameter slab ----
    w1t = p[0:C, 0:C]                                # (C, C)  Linear1 (+BN folded), (in,out)
    w2t = p[0:C, C:2 * C]                            # (C, C)  Linear2, (in,out)
    wdgt = p[0:C, 2 * C:3 * C]                       # (C, C)  DownChannel, GAP half, (in,out)
    wdmt = p[0:C, 3 * C:4 * C]                       # (C, C)  DownChannel, MAP half, (in,out)
    b1f = p[C:C + 1, 0:C]                            # (1, C)  Linear1 bias (+BN folded)
    b2 = p[C:C + 1, C:2 * C]                         # (1, C)
    bd = p[C:C + 1, 2 * C:3 * C]                     # (1, C)

    # ---- pooled statistics over L (lane reductions on the raw x) ----
    gap = jnp.mean(x, axis=2)                        # AdaptiveAvgPool1d(1): (TB, C)
    n_seg = L // MAXPOOL_K
    mx = jnp.max(x[:, :, 0:MAXPOOL_K], axis=2)
    for s in range(1, n_seg):                        # static segment loop
        mx = mx + jnp.max(x[:, :, s * MAXPOOL_K:(s + 1) * MAXPOOL_K], axis=2)
    mapavg = mx * (1.0 / n_seg)                      # MaxPool1d(64,64) -> GAP: (TB, C)

    # ---- shared fc on both branches, stacked along batch: one matmul per layer ----
    g = jnp.concatenate([gap, mapavg], axis=0)       # (2*TB, C)
    h = jnp.maximum(jnp.dot(g, w1t, preferred_element_type=jnp.float32) + b1f, 0.0)
    sig = jax.nn.sigmoid(jnp.dot(h, w2t, preferred_element_type=jnp.float32) + b2)
    gs = g * sig                                     # average * fc(average)

    # ---- DownChannel: Linear(2C -> C) on cat([gap branch, map branch]) ----
    thr = (jnp.dot(gs[0:TB], wdgt, preferred_element_type=jnp.float32)
           + jnp.dot(gs[TB:2 * TB], wdmt, preferred_element_type=jnp.float32)
           + bd)                                     # (TB, C)

    # ---- soft threshold: sign(x) * max(|x| - thr, 0)  (sign(0) = 0) ----
    n_sub = jnp.maximum(jnp.abs(x) - thr[:, :, None], 0.0)
    out_ref[...] = jnp.where(x > 0, n_sub, jnp.where(x < 0, -n_sub, 0.0))


def pack_params(params, C):
    """Pack all parameters into one (C+1, 4C) slab; BN (eval) folded into Linear-1."""
    (w1, b1, bn2s, bn2b, w2, b2, wd, bd) = params
    # (g @ w1.T + b1) * bn2s + bn2b == g @ w1f.T + b1f
    w1f_t = (w1 * bn2s[:, None]).T                   # (in, out)
    b1f = b1 * bn2s + bn2b
    w2t = w2.T                                       # (in, out)
    wdgt = wd[:, :C].T                               # (in, out), GAP half
    wdmt = wd[:, C:].T                               # (in, out), MAP half
    wrow = jnp.concatenate([w1f_t, w2t, wdgt, wdmt], axis=1)             # (C, 4C)
    brow = jnp.concatenate([b1f, b2, bd, jnp.zeros((C,), jnp.float32)]).reshape(1, 4 * C)
    return jnp.concatenate([wrow, brow], axis=0)                         # (C+1, 4C)


def shrinkage_forward(x, params, *, tb=None, vmem_limit_bytes=32 * 1024 * 1024):
    B, C, L = x.shape
    assert L % MAXPOOL_K == 0, "L must be a multiple of 64 (MaxPool1d(64, 64))"
    if tb is None:
        # Prefer a grid of >= 4 steps (>= 2 per TensorCore on v7x) so DMA overlaps
        # compute; the per-step VMEM footprint is tiny so tb is chosen purely for
        # pipelining / per-step overhead. Sweepable for v5e/v6e tuning.
        tb = B
        for cand in (128, 64, 32, 16, 8, 4, 2, 1):
            if cand <= B and B % cand == 0 and B // cand >= 4:
                tb = cand
                break
    assert B % tb == 0, "batch must be divisible by the per-step batch tile"

    slab = pack_params(params, C)
    act_spec = pl.BlockSpec((tb, C, L), lambda b: (b, 0, 0))

    return pl.pallas_call(
        shrinkage_kernel,
        out_shape=jax.ShapeDtypeStruct((B, C, L), jnp.float32),
        grid=(B // tb,),
        in_specs=[act_spec,
                  pl.BlockSpec((C + 1, 4 * C), lambda b: (0, 0))],
        out_specs=act_spec,
        compiler_params=pltpu.CompilerParams(
            dimension_semantics=("parallel",),
            vmem_limit_bytes=vmem_limit_bytes),
    )(x, slab)


# ---------------- pure-JAX reference (for correctness check) ----------------
def shrinkage_ref(x, params):
    (w1, b1, bn2s, bn2b, w2, b2, wd, bd) = params
    B, C, L = x.shape
    hi = lax.Precision.HIGHEST

    def fc(v):                                       # v: (B, C)
        h = jnp.dot(v, w1.T, precision=hi) + b1
        h = h * bn2s + bn2b                          # BatchNorm1d (eval)
        h = jnp.maximum(h, 0.0)
        return jax.nn.sigmoid(jnp.dot(h, w2.T, precision=hi) + b2)

    gap = jnp.mean(x, axis=2)                                            # (B, C)
    mp = jnp.max(x.reshape(B, C, L // MAXPOOL_K, MAXPOOL_K), axis=3)
    mpa = jnp.mean(mp, axis=2)                                           # (B, C)
    x_gap = gap * fc(gap)
    x_map = mpa * fc(mpa)
    thr = jnp.dot(jnp.concatenate([x_gap, x_map], axis=1), wd.T, precision=hi) + bd
    sub = jnp.abs(x) - thr[:, :, None]
    return jnp.sign(x) * jnp.maximum(sub, 0.0)


def init_params(key, C):
    eps = 1e-5
    ks = jax.random.split(key, 8)
    w1 = jax.random.normal(ks[0], (C, C), jnp.float32) * 0.3
    b1 = 0.1 * jax.random.normal(ks[1], (C,), jnp.float32)
    bn2_gamma = 1.0 + 0.1 * jax.random.normal(ks[2], (C,), jnp.float32)
    bn2_beta = 0.1 * jax.random.normal(ks[3], (C,), jnp.float32)
    bn2s = bn2_gamma / jnp.sqrt(1.0 + eps)           # running_var = 1 (eval mode)
    bn2b = bn2_beta                                  # running_mean = 0
    w2 = jax.random.normal(ks[4], (C, C), jnp.float32) * 0.3
    b2 = 0.1 * jax.random.normal(ks[5], (C,), jnp.float32)
    wd = jax.random.normal(ks[6], (C, 2 * C), jnp.float32) * 0.3   # DownChannel (C, 2C)
    bd = 0.1 * jax.random.normal(ks[7], (C,), jnp.float32)
    return (w1, b1, bn2s, bn2b, w2, b2, wd, bd)


if __name__ == "__main__":
    # Shrinkage(in_channel=C, channel=C, gap_size=1); MaxPool1d(64,64) requires L % 64 == 0.
    # C = 8 keeps the (C, L) block tile at the native (8, 128) vreg shape; B = 64 with
    # tb = 16 gives a 4-step parallel grid.
    B, C, L = 64, 8, 128
    key = jax.random.PRNGKey(0)
    kx, kp = jax.random.split(key)
    x = jax.random.normal(kx, (B, C, L), jnp.float32)
    params = init_params(kp, C)

    out = jax.block_until_ready(shrinkage_forward(x, params))
    ref = jax.block_until_ready(shrinkage_ref(x, params))

    assert out.shape == (B, C, L)
    np.testing.assert_allclose(np.asarray(out), np.asarray(ref), rtol=1e-4, atol=1e-4)
    print("KERNEL_OK")
</pallas_src>

<mosaic_0001>
module attributes {stable_mosaic.version = 11 : i64} {
  func.func @shrinkage_kernel(%arg0: i32, %arg1: memref<16x8x128xf32, #tpu.memory_space<vmem>>, %arg2: memref<9x32xf32, #tpu.memory_space<vmem>>, %arg3: memref<16x8x128xf32, #tpu.memory_space<vmem>>) attributes {dimension_semantics = [#tpu.dimension_semantics<parallel>], iteration_bounds = array<i64: 4>, scalar_prefetch = 0 : i64, scratch_operands = 0 : i64, tpu.core_type = #tpu.core_type<tc>, window_params = [{transform_indices = @transform_0, window_bounds = array<i64: 16, 8, 128>}, {pipeline_mode = #tpu.pipeline_mode<synchronous>, transform_indices = @transform_1, window_bounds = array<i64: 9, 32>}, {transform_indices = @transform_2, window_bounds = array<i64: 16, 8, 128>}]} {
    %c0 = arith.constant 0 : index
    %c0_0 = arith.constant 0 : index
    %c0_1 = arith.constant 0 : index
    %0 = vector.load %arg1[%c0, %c0_0, %c0_1] : memref<16x8x128xf32, #tpu.memory_space<vmem>>, vector<16x8x128xf32>
    %c0_2 = arith.constant 0 : index
    %c0_3 = arith.constant 0 : index
    %1 = vector.load %arg2[%c0_2, %c0_3] : memref<9x32xf32, #tpu.memory_space<vmem>>, vector<9x32xf32>
    %2 = vector.extract_strided_slice %1 {offsets = [0, 0], sizes = [8, 8], strides = [1, 1]} : vector<9x32xf32> to vector<8x8xf32>
    %3 = vector.extract_strided_slice %1 {offsets = [0, 8], sizes = [8, 8], strides = [1, 1]} : vector<9x32xf32> to vector<8x8xf32>
    %4 = vector.extract_strided_slice %1 {offsets = [0, 16], sizes = [8, 8], strides = [1, 1]} : vector<9x32xf32> to vector<8x8xf32>
    %5 = vector.extract_strided_slice %1 {offsets = [0, 24], sizes = [8, 8], strides = [1, 1]} : vector<9x32xf32> to vector<8x8xf32>
    %6 = vector.extract_strided_slice %1 {offsets = [8, 0], sizes = [1, 8], strides = [1, 1]} : vector<9x32xf32> to vector<1x8xf32>
    %7 = vector.extract_strided_slice %1 {offsets = [8, 8], sizes = [1, 8], strides = [1, 1]} : vector<9x32xf32> to vector<1x8xf32>
    %8 = vector.extract_strided_slice %1 {offsets = [8, 16], sizes = [1, 8], strides = [1, 1]} : vector<9x32xf32> to vector<1x8xf32>
    %cst = arith.constant dense<0.000000e+00> : vector<16x8xf32>
    %9 = vector.multi_reduction <add>, %0, %cst [2] : vector<16x8x128xf32> to vector<16x8xf32>
    %cst_4 = arith.constant 1.280000e+02 : f32
    %10 = vector.broadcast %cst_4 : f32 to vector<16x8xf32>
    %11 = arith.divf %9, %10 : vector<16x8xf32>
    %12 = vector.extract_strided_slice %0 {offsets = [0, 0, 0], sizes = [16, 8, 64], strides = [1, 1, 1]} : vector<16x8x128xf32> to vector<16x8x64xf32>
    %cst_5 = arith.constant dense<0xFF800000> : vector<16x8xf32>
    %13 = vector.multi_reduction <maximumf>, %12, %cst_5 [2] : vector<16x8x64xf32> to vector<16x8xf32>
    %14 = vector.extract_strided_slice %0 {offsets = [0, 0, 64], sizes = [16, 8, 64], strides = [1, 1, 1]} : vector<16x8x128xf32> to vector<16x8x64xf32>
    %cst_6 = arith.constant dense<0xFF800000> : vector<16x8xf32>
    %15 = vector.multi_reduction <maximumf>, %14, %cst_6 [2] : vector<16x8x64xf32> to vector<16x8xf32>
    %16 = arith.addf %13, %15 : vector<16x8xf32>
    %cst_7 = arith.constant 5.000000e-01 : f32
    %17 = vector.broadcast %cst_7 : f32 to vector<16x8xf32>
    %18 = arith.mulf %16, %17 : vector<16x8xf32>
    %19 = tpu.concatenate %11, %18 in 0 : vector<16x8xf32>, vector<16x8xf32> -> vector<32x8xf32>
    %cst_8 = arith.constant dense<0.000000e+00> : vector<32x8xf32>
    %20 = tpu.matmul %19, %2, %cst_8 {dimension_numbers = #tpu.dot_dimension_numbers<[1], [0], [0], [1], [0, 0, 1, 1], [], []>} : vector<32x8xf32>, vector<8x8xf32>, vector<32x8xf32> -> vector<32x8xf32>
    %21 = vector.broadcast %6 : vector<1x8xf32> to vector<32x8xf32>
    %22 = arith.addf %20, %21 : vector<32x8xf32>
    %cst_9 = arith.constant 0.000000e+00 : f32
    %23 = vector.broadcast %cst_9 : f32 to vector<32x8xf32>
    %24 = arith.maximumf %22, %23 : vector<32x8xf32>
    %cst_10 = arith.constant dense<0.000000e+00> : vector<32x8xf32>
    %25 = tpu.matmul %24, %3, %cst_10 {dimension_numbers = #tpu.dot_dimension_numbers<[1], [0], [0], [1], [0, 0, 1, 1], [], []>} : vector<32x8xf32>, vector<8x8xf32>, vector<32x8xf32> -> vector<32x8xf32>
    %26 = vector.broadcast %7 : vector<1x8xf32> to vector<32x8xf32>
    %27 = arith.addf %25, %26 : vector<32x8xf32>
    %28 = arith.negf %27 : vector<32x8xf32>
    %29 = math.exp %28 : vector<32x8xf32>
    %cst_11 = arith.constant 1.000000e+00 : f32
    %30 = vector.broadcast %cst_11 : f32 to vector<32x8xf32>
    %31 = arith.addf %30, %29 : vector<32x8xf32>
    %32 = arith.divf %30, %31 : vector<32x8xf32>
    %33 = arith.mulf %19, %32 : vector<32x8xf32>
    %34 = vector.extract_strided_slice %33 {offsets = [0, 0], sizes = [16, 8], strides = [1, 1]} : vector<32x8xf32> to vector<16x8xf32>
    %cst_12 = arith.constant dense<0.000000e+00> : vector<16x8xf32>
    %35 = tpu.matmul %34, %4, %cst_12 {dimension_numbers = #tpu.dot_dimension_numbers<[1], [0], [0], [1], [0, 0, 1, 1], [], []>} : vector<16x8xf32>, vector<8x8xf32>, vector<16x8xf32> -> vector<16x8xf32>
    %36 = vector.extract_strided_slice %33 {offsets = [16, 0], sizes = [16, 8], strides = [1, 1]} : vector<32x8xf32> to vector<16x8xf32>
    %cst_13 = arith.constant dense<0.000000e+00> : vector<16x8xf32>
    %37 = tpu.matmul %36, %5, %cst_13 {dimension_numbers = #tpu.dot_dimension_numbers<[1], [0], [0], [1], [0, 0, 1, 1], [], []>} : vector<16x8xf32>, vector<8x8xf32>, vector<16x8xf32> -> vector<16x8xf32>
    %38 = arith.addf %35, %37 : vector<16x8xf32>
    %39 = vector.broadcast %8 : vector<1x8xf32> to vector<16x8xf32>
    %40 = arith.addf %38, %39 : vector<16x8xf32>
    %41 = math.absf %0 : vector<16x8x128xf32>
    %42 = vector.shape_cast %40 : vector<16x8xf32> to vector<16x8x1xf32>
    %43 = vector.broadcast %42 : vector<16x8x1xf32> to vector<16x8x128xf32>
    %44 = arith.subf %41, %43 : vector<16x8x128xf32>
    %cst_14 = arith.constant 0.000000e+00 : f32
    %45 = vector.broadcast %cst_14 : f32 to vector<16x8x128xf32>
    %46 = arith.maximumf %44, %45 : vector<16x8x128xf32>
    %cst_15 = arith.constant 0.000000e+00 : f32
    %47 = vector.broadcast %cst_15 : f32 to vector<16x8x128xf32>
    %48 = arith.cmpf ogt, %0, %47 : vector<16x8x128xf32>
    %cst_16 = arith.constant 0.000000e+00 : f32
    %49 = vector.broadcast %cst_16 : f32 to vector<16x8x128xf32>
    %50 = arith.cmpf olt, %0, %49 : vector<16x8x128xf32>
    %cst_17 = arith.constant 0.000000e+00 : f32
    %51 = vector.broadcast %cst_17 : f32 to vector<16x8x128xf32>
    %52 = arith.subf %51, %46 : vector<16x8x128xf32>
    %cst_18 = arith.constant 0.000000e+00 : f32
    %53 = vector.broadcast %cst_18 : f32 to vector<16x8x128xf32>
    %54 = arith.select %50, %52, %53 : vector<16x8x128xi1>, vector<16x8x128xf32>
    %55 = arith.select %48, %46, %54 : vector<16x8x128xi1>, vector<16x8x128xf32>
    %c0_19 = arith.constant 0 : index
    %c0_20 = arith.constant 0 : index
    %c0_21 = arith.constant 0 : index
    %56 = vector.load %arg3[%c0_19, %c0_20, %c0_21] : memref<16x8x128xf32, #tpu.memory_space<vmem>>, vector<16x8x128xf32>
    tpu.vector_store %arg3[%c0_19, %c0_20, %c0_21], %55 {strides = array<i32>} : memref<16x8x128xf32, #tpu.memory_space<vmem>>, vector<16x8x128xf32>,
    return
  }
  func.func @transform_0(%arg0: i32) -> (i32, i32, i32) {
    %c0_i32 = arith.constant 0 : i32
    %c0_i32_0 = arith.constant 0 : i32
    %c0_i32_1 = arith.constant 0 : i32
    return %arg0, %c0_i32, %c0_i32_0 : i32, i32, i32
  }
  func.func @transform_1(%arg0: i32) -> (i32, i32) {
    %c0_i32 = arith.constant 0 : i32
    %c0_i32_0 = arith.constant 0 : i32
    %c0_i32_1 = arith.constant 0 : i32
    return %c0_i32, %c0_i32_0 : i32, i32
  }
  func.func @transform_2(%arg0: i32) -> (i32, i32, i32) {
    %c0_i32 = arith.constant 0 : i32
    %c0_i32_0 = arith.constant 0 : i32
    %c0_i32_1 = arith.constant 0 : i32
    return %arg0, %c0_i32, %c0_i32_0 : i32, i32, i32
  }
}

</mosaic_0001>

<bundles_post_ra>
// kernel: tpu_custom_call.1
= control target key start
LH: loop header
LB: loop body
LE: loop exit
PB: predicated region body
PF: predicated region fallthrough
CT: control target
= control target key end

     0   :  { %7 = vsyncpa [#allocation3], 0  ;;  %s2265_s0 = inlined_call_operand.hbm [shape: f32[64,8,128], index: 0, kind: input, shape index: {}]   ;;  %s2266_s1 = inlined_call_operand.hbm [shape: f32[9,32], index: 1, kind: input, shape index: {}]   ;;  %s2267_s2 = inlined_call_operand.hbm [shape: f32[64,8,128], index: 2, kind: output, shape index: {}]  }
   0x1   :  { %9 = vsyncpa [#allocation3 + $0x1], 0 }
   0x2   :  { %10 = vsyncpa [#allocation6], 0 }
   0x3   :  { %11 = vsyncpa [#allocation4], 0 }
   0x4   :  { %13 = vsyncpa [#allocation4 + $0x1], 0  ;;  %s1654_s9 = smov 0   ;;  %s1656_s10 = smov 0  }
   0x5   :  { %s1658_s11 = smov 0   ;;  %s1660_s12 = smov 0  }
   0x6 LB: > { %s1675_s13 = sadd.s32 4294967295, %s1627_s12   ;;  %s1338_s14 = sadd.s32 4294967294, %s1627_s12   ;;  %s1627_s12 = sphi %s1660_s12, %s2286_s12   ;;  %s1623_s11 = sphi %s1658_s11, %s2285_s11   ;;  %s1619_s10 = sphi %s1656_s10, %s2284_s10   ;;  %s1615_s9 = sphi %s1654_s9, %s2283_s9  }
   0x7   : > { %p39_p0 = scmp.ne.s32.totalorder %s1619_s10, %s1615_s9  ;;  %p2268_p1 = scmp.eq.s32.totalorder %s1675_s13, 0 }
   0x8   : > { %p90_p3 = scmp.eq.s32.totalorder %s1338_s14, 3  ;;  %p1339_p5 = scmp.ge.s32.totalorder %s1627_s12, 1 }
   0x9   : > { %p1684_p4 = por %p2268_p1, %p39_p0  ;;  %p97_p7 = scmp.lt.s32.totalorder %s1627_s12, 5 }
   0xa   : > { %p1689_p6 = por %p90_p3, %p39_p0  ;;  %s1629_s18 = smov [#allocation5]  }
   0xb   : > { %s2271_s15 = scalar_select %p1684_p4, 1, 0 }
   0xc   : > { %s2272_s16 = scalar_select %p1689_p6, 1, 0 }
   0xd   : > { %p1694_p8 = pnand %p1339_p5, %p97_p7  ;;  %s109_s19 = sshll.u32 %s1629_s18, 4  ;;  %s110_s19 = int_to_ptr.vmem [resolvable:$true] %s109_s19 }
   0xe   : > { %s1707_s21 = sadd.s32 1, %s1627_s12   ;;  %s26_s22 = sadd.s32 1, %s1623_s11 }
   0xf   : > { %s2273_s17 = scalar_select %p1694_p8, 1, 0 }
  0x10   : > { %p1427_p9 = pneg %p1694_p8  ;;  %s23_s23 = ssub.s32 %s1627_s12, %s1707_s21 }
  0x11   : > { %s1499_s26 = scalar_lea.hbm %s2266_s1, 256 }
  0x12   : > { %p1702_p10 = pnand %p1427_p9, %p2268_p1  ;;  %p1500_p11 = scmp.ne.s32.totalorder %s2266_s1, %s1499_s26 }
  0x13   : > { %p1506_p3 = scmp.lt.u32.totalorder %s1499_s26, %s2266_s1 }
  0x14   : > { %p1501_p12 = pneg %p1702_p10 }
  0x16   : > { %p1502_p13 = pnand %p1501_p12, %p1500_p11 }
  0x18   : > { %p1503_p0 = pneg %p1502_p13 }
  0x1a   : > { %p1508_p5 = pnand %p1506_p3, %p1503_p0 }
  0x1c   : > { %1511 = shalt.err (!%p1508_p5)
}
  0x1d   : > { %s1512_s3 = scalar_lea.vmem %s110_s19, 256  ;;  %p1520_p2 = scmp.lt.s32.totalorder %s110_s19, %s110_s19 }
  0x1e   : > { %p1513_p7 = scmp.ne.s32.totalorder %s110_s19, %s1512_s3  ;;  %p1521_p6 = scmp.lt.s32.totalorder %s1512_s3, %s1512_s3 }
  0x20   : > { %p1515_p9 = pnand %p1513_p7, %p1501_p12  ;;  %p1522_p4 = por %p1521_p6, %p1520_p2 }
  0x22   : > { %p1516_p1 = pneg %p1515_p9 }
  0x24   : > { %p1523_p8 = pnand %p1522_p4, %p1516_p1 }
  0x26   : > { %1526 = shalt.err (!%p1523_p8)
}
  0x27   : > { %s1630_s4 = smov 128   ;;  %s1631_s5 = smov 8  }
  0x28   : > { %1430 = dma.hbm_to_vmem [thread:$0]  (!%p1702_p10), %s2266_s1, 256, %s110_s19, [#allocation6], %s1630_s4, %s1630_s4, %s1631_s5  }
  0x29   : > { %p24_p1 = scmp.eq.s32.totalorder %s23_s23, 0  ;;  %p33_p2 = scmp.ne.s32.totalorder %s1623_s11, %s1619_s10 }
  0x2a   : > { %p34_p4 = scmp.eq.s32.totalorder %s1627_s12, 0  ;;  %p1440_p6 = scmp.lt.s32.totalorder %s1627_s12, 4 }
  0x2b   : > { %s1736_s8 = scalar_select %p24_p1, %s1623_s11, %s26_s22  }
  0x2c   : > { %p35_p8 = por %p34_p4, %p33_p2  ;;  %p2275_p11 = scmp.eq.s32.totalorder %s1675_s13, 3 }
  0x2d   : > { %s123_s18 = sand.u32 1, %s1623_s11   ;;  %s1371_s20 = sshll.u32 %s1627_s12, 11 }
  0x2e   : > { %p1740_p12 = por %p2275_p11, %p33_p2  ;;  %s1342_s24 = sshll.u32 %s123_s18, 7 }
  0x2f   : > { %s1749_s27 = scalar_lea.hbm %s2265_s0, %s1371_s20  ;;  %s127_s19 = scalar_lea.vmem [#allocation2], %s1342_s24 }
  0x30   : > { %s134_s22 = sshll.u32 %s127_s19, 4  ;;  %p1751_p10 = pnand %p1440_p6, %p35_p8  ;;  %s1755_s22 = int_to_ptr.vmem [resolvable:$true] %s134_s22 }
  0x31   : > { %s1757_s28 = scalar_lea.sflag [#allocation3], %s123_s18  ;;  %s1527_s29 = scalar_lea.hbm %s1749_s27, 2048 }
  0x32   : > { %p1528_p13 = scmp.ne.s32.totalorder %s1749_s27, %s1527_s29  ;;  %p1529_p0 = pneg %p1751_p10 }
  0x33   : > { %s1532_s6 = scalar_lea.hbm %s2265_s0, 8192  ;;  %p1533_p7 = scmp.lt.u32.totalorder %s1749_s27, %s2265_s0 }
  0x34   : > { %p1530_p3 = pnand %p1529_p0, %p1528_p13  ;;  %p1534_p9 = scmp.lt.u32.totalorder %s1532_s6, %s1527_s29 }
  0x35   : > { %p1536_p2 = scmp.lt.u32.totalorder %s1527_s29, %s1749_s27 }
  0x36   : > { %p1531_p5 = pneg %p1530_p3  ;;  %p1535_p1 = por %p1534_p9, %p1533_p7 }
  0x38   : > { %p1537_p4 = por %p1536_p2, %p1535_p1 }
  0x3a   : > { %p1538_p6 = pnand %p1537_p4, %p1531_p5 }
  0x3c   : > { %1541 = shalt.err (!%p1538_p6)
}
  0x3d   : > { %s1542_s18 = scalar_lea.vmem %s1755_s22, 2048  ;;  %s1632_s24 = smov [#allocation2]  }
  0x3e   : > { %p1543_p8 = scmp.ne.s32.totalorder %s1755_s22, %s1542_s18  ;;  %s1547_s25 = sshll.u32 %s1632_s24, 4  ;;  %s1548_s25 = int_to_ptr.vmem [resolvable:$false] %s1547_s25 }
  0x3f   : > { %s1549_s26 = scalar_lea.vmem %s1548_s25, 4096  ;;  %p1550_p3 = scmp.lt.s32.totalorder %s1755_s22, %s1548_s25 }
  0x40   : > { %p1545_p11 = pnand %p1543_p8, %p1529_p0  ;;  %p1551_p7 = scmp.lt.s32.totalorder %s1549_s26, %s1542_s18 }
  0x42   : > { %p1546_p13 = pneg %p1545_p11  ;;  %p1552_p9 = por %p1551_p7, %p1550_p3 }
  0x44   : > { %p1553_p1 = pnand %p1552_p9, %p1546_p13 }
  0x46   : > { %1556 = shalt.err (!%p1553_p1)
}
  0x47   : > { %1434 = dma.hbm_to_vmem [thread:$0]  (!%p1751_p10), %s1749_s27, 2048, %s1755_s22, %s1757_s28, %s1630_s4, %s1630_s4, %s1631_s5  }
  0x48   : > { %p2278_p0 = scmp.ne.s32.totalorder %s2273_s17, 0 }
  0x49   : > { %s1791_s19 = sand.u32 (!%p2278_p0), 1, %s1619_s10   ;;  %p2279_p5 = scmp.ne.s32.totalorder (!%p2278_p0), %s2271_s15, 0 }
  0x4a   : > { %146 = sbr.rel (%p2278_p0) target bundleno = 1179 (0x49b), region = 28  ;;  %s1346_s29 = sshll.u32 (!%p2278_p0), %s1791_s19, 7 }
  0x4b   : > { %s149_s30 = scalar_lea.sflag (!%p2278_p0), [#allocation3], %s1791_s19  ;;  %s1797_s23 = scalar_lea.vmem (!%p2278_p0), [#allocation2], %s1346_s29 }
  0x51   : > { %1602 = dma.done.wait (%p2279_p5), %s149_s30, 2048  }
  0x52   : > { %1604 = vsyncadd (%p2279_p5), %s149_s30, 4294965248  ;;  %p2280_p10 = scmp.eq.s32.totalorder %s1675_s13, 0 }
  0x54   : > { %1606 = dma.done.wait (%p2280_p10), [#allocation6], 256   ;;  %p2281_p2 = pmov %p2280_p10 }
  0x55   : > { %v1808_v0 = vld [vmem:[%s1797_s23 + $0x10] sm:$0xff]  ;;  %v1811_v1 = vld [vmem:[%s1797_s23] sm:$0xff]  ;;  %v1819_v3 = vld [vmem:[%s1797_s23 + $0x8] sm:$0xff]  ;;  %vm246_vm0 = vcmask 523264   ;;  %vm295_vm1 = vcmask 1048064   ;;  %s1633_s15 = smov 120   ;;  %v392_v57 = vlaneseq }
  0x56   : > { %1608 = vsyncadd (%p2281_p2), [#allocation6], 4294967040  ;;  %201 = vadd.xlane.f32.xlu1 %v1808_v0  ;;  %197 = vadd.xlane.f32.xlu0 %v1811_v1  ;;  %v1816_v2 = vld [vmem:[%s1797_s23 + $0x40] sm:$0xff]  ;;  %v1824_v4 = vld [vmem:[%s1797_s23 + $0x18] sm:$0xff]  ;;  %v247_v7 = vsel %vm246_vm0, %v1811_v1, -inf  ;;  %v250_v8 = vsel %vm246_vm0, %v1819_v3, -inf }
  0x57   : > { %v1827_v5 = vld [vmem:[%s1797_s23 + $0x48] sm:$0xff]  ;;  %v1832_v6 = vld [vmem:[%s1797_s23 + $0x50] sm:$0xff]  ;;  %v296_v9 = vsel %vm295_vm1, %v1811_v1, -inf  ;;  %v299_v10 = vsel %vm295_vm1, %v1819_v3, -inf  ;;  %v1844_v11 = vld [vmem:[%s1797_s23 + $0x20] sm:$0xff]  ;;  %v253_v13 = vsel %vm246_vm0, %v1808_v0, -inf }
  0x58   : > { %v1848_v12 = vld [vmem:[%s1797_s23 + $0x58] sm:$0xff]  ;;  %v271_v14 = vsel %vm246_vm0, %v1816_v2, -inf  ;;  %v274_v15 = vsel %vm246_vm0, %v1827_v5, -inf  ;;  %v302_v16 = vsel %vm295_vm1, %v1808_v0, -inf  ;;  %v320_v17 = vsel %vm295_vm1, %v1816_v2, -inf  ;;  %v1864_v19 = vld [vmem:[%s1797_s23 + $0x28] sm:$0xff] }
  0x59   : > { %v323_v18 = vsel %vm295_vm1, %v1827_v5, -inf  ;;  %v1868_v20 = vld [vmem:[%s1797_s23 + $0x60] sm:$0xff]  ;;  %v256_v21 = vsel %vm246_vm0, %v1824_v4, -inf  ;;  %v277_v22 = vsel %vm246_vm0, %v1832_v6, -inf  ;;  %v305_v23 = vsel %vm295_vm1, %v1824_v4, -inf  ;;  %v1880_v25 = vld [vmem:[%s1797_s23 + $0x30] sm:$0xff] }
  0x5a   : > { %213 = vadd.xlane.f32.xlu1 %v1816_v2  ;;  %199 = vadd.xlane.f32.xlu0 %v1819_v3  ;;  %v326_v24 = vsel %vm295_vm1, %v1832_v6, -inf  ;;  %v1884_v26 = vld [vmem:[%s1797_s23 + $0x68] sm:$0xff]  ;;  %v259_v27 = vsel %vm246_vm0, %v1844_v11, -inf  ;;  %v280_v28 = vsel %vm246_vm0, %v1848_v12, -inf  ;;  %v308_v29 = vsel %vm295_vm1, %v1844_v11, -inf  ;;  %v1896_v31 = vld [vmem:[%s1797_s23 + $0x38] sm:$0xff] }
  0x5b   : > { %v329_v30 = vsel %vm295_vm1, %v1848_v12, -inf  ;;  %v1900_v32 = vld [vmem:[%s1797_s23 + $0x70] sm:$0xff]  ;;  %v262_v33 = vsel %vm246_vm0, %v1864_v19, -inf  ;;  %v283_v34 = vsel %vm246_vm0, %v1868_v20, -inf  ;;  %v311_v35 = vsel %vm295_vm1, %v1864_v19, -inf  ;;  %v1912_v37 = vld [vmem:[%s1797_s23 + $0x78] sm:$0xff] }
  0x5c   : > { %v332_v36 = vsel %vm295_vm1, %v1868_v20, -inf  ;;  %v265_v38 = vsel %vm246_vm0, %v1880_v25, -inf  ;;  %v286_v39 = vsel %vm246_vm0, %v1884_v26, -inf  ;;  %v314_v40 = vsel %vm295_vm1, %v1880_v25, -inf  ;;  %v1931_v46 = vld [vmem:[#allocation5] sm:$0xff]  ;;  %s1634_s17 = smov 104  }
  0x5d   : > { %v335_v41 = vsel %vm295_vm1, %v1884_v26, -inf  ;;  %v268_v42 = vsel %vm246_vm0, %v1896_v31, -inf  ;;  %v289_v43 = vsel %vm246_vm0, %v1900_v32, -inf  ;;  %v317_v44 = vsel %vm295_vm1, %v1896_v31, -inf  ;;  %1389 = vmatprep.subr.mxu0 %v1931_v46  ;;  %1415 = vmatprep.subr.mxu1 %v1931_v46  ;;  %s1635_s4 = smov 112   ;;  %s2119_s5 = scalar_lea.vmem [#allocation7], %s1346_s29 }
  0x5e   : > { %203 = vadd.xlane.f32.xlu1 %v1824_v4  ;;  %215 = vadd.xlane.f32.xlu0 %v1827_v5  ;;  %v338_v45 = vsel %vm295_vm1, %v1900_v32, -inf  ;;  %v292_v47 = vsel %vm246_vm0, %v1912_v37, -inf  ;;  %v341_v48 = vsel %vm295_vm1, %v1912_v37, -inf  ;;  %v393_v61 = vand.u32 127, %v392_v57  ;;  %s1372_s27 = sshll.u32 %s1675_s13, 11  ;;  %s1255_s22 = sshll.u32 %s2119_s5, 4  ;;  %s2220_s22 = int_to_ptr.vmem [resolvable:$true] %s1255_s22 }
  0x5f   : > { %1390 = vmatpush3.msra.mxu0 %v1931_v46  ;;  %1416 = vmatpush3.msra.mxu1 %v1931_v46  ;;  %v1949_v62 = vshrl.u32 %v392_v57, 7  ;;  %vm458_vm2 = vcmask 1041409   ;;  %vm460_vm3 = vcmask 1042434   ;;  %vm462_vm4 = vcmask 1043459   ;;  %s2218_s3 = scalar_lea.hbm %s2267_s2, %s1372_s27  ;;  %s1242_s6 = scalar_lea.sflag [#allocation4], %s1791_s19 }
  0x60   : > { %vm464_vm5 = vcmask 1044484   ;;  %vm466_vm6 = vcmask 1045509   ;;  %vm468_vm7 = vcmask 1046534   ;;  %vm470_vm8 = vcmask 1047559   ;;  %s1557_s7 = scalar_lea.vmem %s2220_s22, 2048  ;;  %s1636_s20 = smov [#allocation7]  }
  0x61   : > { %vm581_vm9 = vcmask 64512   ;;  %vm1154_vm10 = vcmp.gt.f32.partialorder %v1827_v5, 0.0  ;;  %vm1170_vm11 = vcmp.lt.f32.partialorder %v1827_v5, 0.0  ;;  %vm1153_vm12 = vcmp.gt.f32.partialorder %v1816_v2, 0.0  ;;  %p1558_p4 = scmp.ne.s32.totalorder %s2220_s22, %s1557_s7  ;;  %s1561_s18 = sshll.u32 %s1636_s20, 4  ;;  %s1562_s18 = int_to_ptr.vmem [resolvable:$false] %s1561_s18 }
  0x62   : > { %217 = vadd.xlane.f32.xlu0 %v1832_v6  ;;  %248 = vmax.xlane.f32.xlu1 %v247_v7  ;;  %vm1169_vm13 = vcmp.lt.f32.partialorder %v1816_v2, 0.0  ;;  %vm1156_vm14 = vcmp.gt.f32.partialorder %v1848_v12, 0.0  ;;  %vm1172_vm15 = vcmp.lt.f32.partialorder %v1848_v12, 0.0  ;;  %vm1155_vm0 = vcmp.gt.f32.partialorder %v1832_v6, 0.0  ;;  %s1563_s24 = scalar_lea.vmem %s1562_s18, 4096  ;;  %p1564_p11 = scmp.lt.s32.totalorder %s2220_s22, %s1562_s18 }
  0x63   : > { %vm1171_vm1 = vcmp.lt.f32.partialorder %v1832_v6, 0.0  ;;  %p1559_p6 = pnand %p1558_p4, %p1740_p12  ;;  %p1565_p13 = scmp.lt.s32.totalorder %s1563_s24, %s1557_s7 }
  0x65   : > { %p1560_p8 = pneg %p1559_p6  ;;  %p1566_p3 = por %p1565_p13, %p1564_p11 }
  0x66   : > { %251 = vmax.xlane.f32.xlu0 %v250_v8  ;;  %297 = vmax.xlane.f32.xlu1 %v296_v9 }
  0x67   : > { %p1567_p7 = pnand %p1566_p3, %p1560_p8 }
  0x6a   : > { %300 = vmax.xlane.f32.xlu0 %v299_v10  ;;  %205 = vadd.xlane.f32.xlu1 %v1844_v11  ;;  %v1952_v10 = vsub.s32 %v393_v61, %v1949_v62 }
  0x6e   : > { %219 = vadd.xlane.f32.xlu0 %v1848_v12  ;;  %254 = vmax.xlane.f32.xlu1 %v253_v13 }
  0x72   : > { %272 = vmax.xlane.f32.xlu0 %v271_v14  ;;  %275 = vmax.xlane.f32.xlu1 %v274_v15 }
  0x76   : > { %303 = vmax.xlane.f32.xlu0 %v302_v16  ;;  %321 = vmax.xlane.f32.xlu1 %v320_v17 }
  0x7a   : > { %324 = vmax.xlane.f32.xlu0 %v323_v18  ;;  %207 = vadd.xlane.f32.xlu1 %v1864_v19 }
  0x7e   : > { %221 = vadd.xlane.f32.xlu0 %v1868_v20  ;;  %257 = vmax.xlane.f32.xlu1 %v256_v21 }
  0x82   : > { %278 = vmax.xlane.f32.xlu0 %v277_v22  ;;  %306 = vmax.xlane.f32.xlu1 %v305_v23 }
  0x86   : > { %327 = vmax.xlane.f32.xlu0 %v326_v24  ;;  %209 = vadd.xlane.f32.xlu1 %v1880_v25 }
  0x8a   : > { %223 = vadd.xlane.f32.xlu0 %v1884_v26  ;;  %260 = vmax.xlane.f32.xlu1 %v259_v27 }
  0x8e   : > { %281 = vmax.xlane.f32.xlu0 %v280_v28  ;;  %309 = vmax.xlane.f32.xlu1 %v308_v29 }
  0x92   : > { %330 = vmax.xlane.f32.xlu0 %v329_v30  ;;  %211 = vadd.xlane.f32.xlu1 %v1896_v31 }
  0x96   : > { %225 = vadd.xlane.f32.xlu0 %v1900_v32  ;;  %263 = vmax.xlane.f32.xlu1 %v262_v33 }
  0x9a   : > { %284 = vmax.xlane.f32.xlu0 %v283_v34  ;;  %312 = vmax.xlane.f32.xlu1 %v311_v35 }
  0x9e   : > { %333 = vmax.xlane.f32.xlu0 %v332_v36  ;;  %227 = vadd.xlane.f32.xlu1 %v1912_v37 }
  0xa2   : > { %266 = vmax.xlane.f32.xlu0 %v265_v38  ;;  %287 = vmax.xlane.f32.xlu1 %v286_v39 }
  0xa6   : > { %315 = vmax.xlane.f32.xlu0 %v314_v40  ;;  %336 = vmax.xlane.f32.xlu1 %v335_v41 }
  0xaa   : > { %269 = vmax.xlane.f32.xlu0 %v268_v42  ;;  %290 = vmax.xlane.f32.xlu1 %v289_v43 }
  0xae   : > { %318 = vmax.xlane.f32.xlu0 %v317_v44  ;;  %339 = vmax.xlane.f32.xlu1 %v338_v45 }
  0xb2   : > { %293 = vmax.xlane.f32.xlu0 %v292_v47  ;;  %342 = vmax.xlane.f32.xlu1 %v341_v48 }
  0xc8   : > { %680 = vrot.lane.b32.xlu0 %v1931_v46, %s1633_s15 }
  0xe3   : > { %v202_v49 = vpop.xlane.xlu1 %201  ;;  %v198_v50 = vpop.xlane.xlu0 %197 }
  0xe4   : > { %v230_v39 = vmul.f32 0.0078125, %v198_v50  ;;  %v232_v44 = vmul.f32 0.0078125, %v202_v49 }
  0xe6   : > { %v397_v47 = vrot.slane %v230_v39, %v1952_v10 }
  0xe7   : > { %v1943_v51 = vpop.xlane.xlu1 %213  ;;  %v200_v52 = vpop.xlane.xlu0 %199 }
  0xe8   : > { %v231_v38 = vmul.f32 0.0078125, %v200_v52  ;;  %v405_v52 = vrot.slane %v232_v44, %v1952_v10 }
  0xea   : > { %v401_v42 = vrot.slane %v231_v38, %v1952_v10 }
  0xeb   : > { %v204_v53 = vpop.xlane.xlu1 %203  ;;  %v1945_v54 = vpop.xlane.xlu0 %215 }
  0xec   : > { %v233_v43 = vmul.f32 0.0078125, %v204_v53 }
  0xee   : > { %v409_v50 = vrot.slane %v233_v43, %v1952_v10  ;;  %v238_v43 = vmul.f32 0.0078125, %v1943_v51 }
  0xef   : > { %v1947_v55 = vpop.xlane.xlu0 %217  ;;  %v249_v56 = vpop.xlane.xlu1 %248 }
  0xf3   : > { %v252_v58 = vpop.xlane.xlu0 %251  ;;  %v298_v59 = vpop.xlane.xlu1 %297 }
  0xf4   : > { %v344_v60 = vadd.f32 %v298_v59, %v249_v56  ;;  %v459_v59 = vsel %vm458_vm2, %v401_v42, %v397_v47 }
  0xf5   : > { %v461_v53 = vsel %vm460_vm3, %v405_v52, %v459_v59  ;;  %v429_v52 = vrot.slane %v238_v43, %v1952_v10 }
  0xf6   : > { %v360_v8 = vmul.f32 0.5, %v344_v60 }
  0xf7   : > { %v301_v63 = vpop.xlane.xlu0 %300  ;;  %v206_v7 = vpop.xlane.xlu1 %205 }
  0xf8   : > { %v345_v9 = vadd.f32 %v301_v63, %v252_v58  ;;  %v500_v16 = vrot.slane %v360_v8, %v1952_v10  ;;  %v234_v45 = vmul.f32 0.0078125, %v206_v7  ;;  %v463_v8 = vsel %vm462_vm4, %v409_v50, %v461_v53 }
  0xfa   : > { %v361_v13 = vmul.f32 0.5, %v345_v9  ;;  %v413_v60 = vrot.slane %v234_v45, %v1952_v10 }
  0xfb   : > { %v220_v14 = vpop.xlane.xlu0 %219  ;;  %v1954_v15 = vpop.xlane.xlu1 %254 }
  0xfc   : > { %v504_v17 = vrot.slane %v361_v13, %v1952_v10  ;;  %v465_v13 = vsel %vm464_vm5, %v413_v60, %v463_v8  ;;  %v241_v44 = vmul.f32 0.0078125, %v220_v14 }
  0xfe   : > { %v1959_v18 = vsel %vm458_vm2, %v504_v17, %v500_v16  ;;  %v239_v16 = vmul.f32 0.0078125, %v1945_v54  ;;  %v441_v51 = vrot.slane %v241_v44, %v1952_v10 }
  0xff   : > { %v1961_v21 = vpop.xlane.xlu0 %272  ;;  %v1963_v22 = vpop.xlane.xlu1 %275 }
 0x100   : > { %v433_v54 = vrot.slane %v239_v16, %v1952_v10 }
 0x102   : > { %v472_v60 = vsel %vm458_vm2, %v433_v54, %v429_v52 }
 0x103   : > { %v1965_v23 = vpop.xlane.xlu0 %303  ;;  %v1967_v24 = vpop.xlane.xlu1 %321 }
 0x104   : > { %v352_v52 = vadd.f32 %v1967_v24, %v1961_v21 }
 0x107   : > { %v1969_v27 = vpop.xlane.xlu0 %324  ;;  %v208_v28 = vpop.xlane.xlu1 %207 }
 0x108   : > { %v235_v48 = vmul.f32 0.0078125, %v208_v28  ;;  %v353_v44 = vadd.f32 %v1969_v27, %v1963_v22 }
 0x10a   : > { %v417_v49 = vrot.slane %v235_v48, %v1952_v10 }
 0x10b   : > { %v222_v29 = vpop.xlane.xlu0 %221  ;;  %v1971_v30 = vpop.xlane.xlu1 %257 }
 0x10c   : > { %v467_v28 = vsel %vm466_vm6, %v417_v49, %v465_v13  ;;  %v242_v47 = vmul.f32 0.0078125, %v222_v29 }
 0x10e   : > { %v445_v14 = vrot.slane %v242_v47, %v1952_v10 }
 0x10f   : > { %v1973_v33 = vpop.xlane.xlu0 %278  ;;  %v1975_v34 = vpop.xlane.xlu1 %306 }
 0x110   : > { %v347_v43 = vadd.f32 %v1975_v34, %v1971_v30  ;;  %v369_v30 = vmul.f32 0.5, %v353_v44 }
 0x113   : > { %v1977_v35 = vpop.xlane.xlu0 %327  ;;  %v210_v36 = vpop.xlane.xlu1 %209 }
 0x114   : > { %v236_v56 = vmul.f32 0.0078125, %v210_v36  ;;  %v240_v36 = vmul.f32 0.0078125, %v1947_v55 }
 0x116   : > { %v421_v61 = vrot.slane %v236_v56, %v1952_v10  ;;  %v437_v56 = vrot.slane %v240_v36, %v1952_v10 }
 0x117   : > { %v224_v40 = vpop.xlane.xlu0 %223  ;;  %v1979_v41 = vpop.xlane.xlu1 %260 }
 0x118   : > { %v469_v42 = vsel %vm468_vm7, %v421_v61, %v467_v28  ;;  %v243_v48 = vmul.f32 0.0078125, %v224_v40  ;;  %v473_v49 = vsel %vm460_vm3, %v437_v56, %v472_v60 }
 0x11a   : > { %v449_v29 = vrot.slane %v243_v48, %v1952_v10 }
 0x11b   : > { %v1983_v57 = vpop.xlane.xlu0 %281  ;;  %v310_v58 = vpop.xlane.xlu1 %309 }
 0x11c   : > { %v348_v47 = vadd.f32 %v310_v58, %v1979_v41 }
 0x11e   : > { %v364_v34 = vmul.f32 0.5, %v348_v47 }
 0x11f   : > { %v331_v63 = vpop.xlane.xlu0 %330  ;;  %v212_v7 = vpop.xlane.xlu1 %211 }
 0x120   : > { %v237_v9 = vmul.f32 0.0078125, %v212_v7  ;;  %v474_v7 = vsel %vm462_vm4, %v441_v51, %v473_v49  ;;  %v363_v51 = vmul.f32 0.5, %v347_v43 }
 0x122   : > { %v425_v17 = vrot.slane %v237_v9, %v1952_v10  ;;  %v475_v9 = vsel %vm464_vm5, %v445_v14, %v474_v7  ;;  %v355_v14 = vadd.f32 %v331_v63, %v1983_v57  ;;  %v512_v21 = vrot.slane %v363_v51, %v1952_v10 }
 0x123   : > { %v226_v38 = vpop.xlane.xlu0 %225  ;;  %v264_v39 = vpop.xlane.xlu1 %263  ;;  %v476_v13 = vsel %vm466_vm6, %v449_v29, %v475_v9 }
 0x124   : > { %v2001_v45 = vsel %vm470_vm8, %v425_v17, %v469_v42  ;;  %v244_v55 = vmul.f32 0.0078125, %v226_v38  ;;  %v346_v42 = vadd.f32 %v1965_v23, %v1954_v15  ;;  %v354_v15 = vadd.f32 %v1977_v35, %v1973_v33 }
 0x125   : > { %1391 = vmatprep.mubr.msk.f32.mxu0 %vm581_vm9, %v2001_v45  ;;  %v371_v24 = vmul.f32 0.5, %v355_v14  ;;  %v536_v33 = vrot.slane %v369_v30, %v1952_v10  ;;  %v516_v35 = vrot.slane %v364_v34, %v1952_v10 }
 0x126   : > { %v453_v53 = vrot.slane %v244_v55, %v1952_v10  ;;  %v362_v55 = vmul.f32 0.5, %v346_v42  ;;  %v370_v29 = vmul.f32 0.5, %v354_v15 }
 0x127   : > { %v285_v59 = vpop.xlane.xlu0 %284  ;;  %v313_v50 = vpop.xlane.xlu1 %312 }
 0x128   : > { %v477_v36 = vsel %vm468_vm7, %v453_v53, %v476_v13  ;;  %v349_v56 = vadd.f32 %v313_v50, %v264_v39  ;;  %v508_v39 = vrot.slane %v362_v55, %v1952_v10  ;;  %v368_v50 = vmul.f32 0.5, %v352_v52 }
 0x129   : > { %v540_v13 = vrot.slane %v370_v29, %v1952_v10 }
 0x12a   : > { %v365_v41 = vmul.f32 0.5, %v349_v56  ;;  %v532_v9 = vrot.slane %v368_v50, %v1952_v10 }
 0x12b   : > { %v334_v40 = vpop.xlane.xlu0 %333  ;;  %v228_v61 = vpop.xlane.xlu1 %227 }
 0x12c   : > { %v245_v8 = vmul.f32 0.0078125, %v228_v61  ;;  %v356_v60 = vadd.f32 %v334_v40, %v285_v59  ;;  %v520_v59 = vrot.slane %v365_v41, %v1952_v10  ;;  %v568_v43 = vsel %vm458_vm2, %v536_v33, %v532_v9 }
 0x12d   : > { %v569_v15 = vsel %vm460_vm3, %v540_v13, %v568_v43  ;;  %vm1158_vm2 = vcmp.gt.f32.partialorder %v1884_v26, 0.0 }
 0x12e   : > { %v457_v16 = vrot.slane %v245_v8, %v1952_v10  ;;  %v372_v57 = vmul.f32 0.5, %v356_v60  ;;  %v562_v8 = vsel %vm460_vm3, %v508_v39, %v1959_v18  ;;  %v1349_v39 = vld [vmem:[#allocation5 + $0x8] ss:$0 sm:$0xff]  ;;  %vm1174_vm3 = vcmp.lt.f32.partialorder %v1884_v26, 0.0 }
 0x12f   : > { %v267_v17 = vpop.xlane.xlu0 %266  ;;  %v288_v28 = vpop.xlane.xlu1 %287  ;;  %684 = vrot.lane.b32.xlu1 %v1349_v39, %s1633_s15  ;;  %980 = vrot.lane.b32.xlu0 %v1349_v39, %s1635_s4 }
 0x130   : > { %v2020_v38 = vsel %vm470_vm8, %v457_v16, %v477_v36  ;;  %v548_v44 = vrot.slane %v372_v57, %v1952_v10 }
 0x131   : > { %1392 = vmatmul.mubr.msk.f32.vlgmr.msra.gmra.mrb[0].mxu0 %vm581_vm9, %v2020_v38 }
 0x133   : > { %v316_v54 = vpop.xlane.xlu0 %315  ;;  %v337_v48 = vpop.xlane.xlu1 %336  ;;  %812 = vrot.lane.b32.xlu1 %v1931_v46, %s1634_s17 }
 0x134   : > { %v350_v23 = vadd.f32 %v316_v54, %v267_v17  ;;  %v357_v58 = vadd.f32 %v337_v48, %v288_v28  ;;  %v563_v17 = vsel %vm462_vm4, %v512_v21, %v562_v8  ;;  %v544_v28 = vrot.slane %v371_v24, %v1952_v10 }
 0x135   : > { %v564_v18 = vsel %vm464_vm5, %v516_v35, %v563_v17 }
 0x136   : > { %v366_v49 = vmul.f32 0.5, %v350_v23  ;;  %v373_v40 = vmul.f32 0.5, %v357_v58  ;;  %v565_v52 = vsel %vm466_vm6, %v520_v59, %v564_v18  ;;  %v570_v14 = vsel %vm462_vm4, %v544_v28, %v569_v15 }
 0x137   : > { %v270_v22 = vpop.xlane.xlu0 %269  ;;  %v291_v27 = vpop.xlane.xlu1 %290  ;;  %v571_v60 = vsel %vm464_vm5, %v548_v44, %v570_v14  ;;  %896 = vrot.lane.b32.xlu1 %v1931_v46, %s1635_s4  ;;  %vm1157_vm4 = vcmp.gt.f32.partialorder %v1868_v20, 0.0  ;;  %vm1173_vm5 = vcmp.lt.f32.partialorder %v1868_v20, 0.0 }
 0x138   : > { %v524_v16 = vrot.slane %v366_v49, %v1952_v10  ;;  %v552_v48 = vrot.slane %v373_v40, %v1952_v10 }
 0x13a   : > { %v566_v51 = vsel %vm468_vm7, %v524_v16, %v565_v52 }
 0x13b   : > { %v319_v63 = vpop.xlane.xlu0 %318  ;;  %v340_v53 = vpop.xlane.xlu1 %339 }
 0x13c   : > { %v351_v61 = vadd.f32 %v319_v63, %v270_v22  ;;  %v358_v7 = vadd.f32 %v340_v53, %v291_v27  ;;  %v572_v22 = vsel %vm466_vm6, %v552_v48, %v571_v60  ;;  %vm1146_vm6 = vcmp.gt.f32.partialorder %v1819_v3, 0.0 }
 0x13e   : > { %v367_v36 = vmul.f32 0.5, %v351_v61  ;;  %v374_v42 = vmul.f32 0.5, %v358_v7 }
 0x13f   : > { %v294_v47 = vpop.xlane.xlu0 %293  ;;  %v343_v54 = vpop.xlane.xlu1 %342 }
 0x140   : > { %v528_v56 = vrot.slane %v367_v36, %v1952_v10  ;;  %v359_v55 = vadd.f32 %v343_v54, %v294_v47  ;;  %v556_v23 = vrot.slane %v374_v42, %v1952_v10 }
 0x142   : > { %v375_v30 = vmul.f32 0.5, %v359_v55  ;;  %v2059_v34 = vsel %vm470_vm8, %v528_v56, %v566_v51  ;;  %v573_v41 = vsel %vm468_vm7, %v556_v23, %v572_v22  ;;  %vm1162_vm7 = vcmp.lt.f32.partialorder %v1819_v3, 0.0 }
 0x143   : > { %1394 = vmatprep.mubr.msk.f32.mxu1 %vm581_vm9, %v2059_v34  ;;  %v681_v50 = vpop.permute.xlu0 %680 }
 0x144   : > { %v560_v27 = vrot.slane %v375_v30, %v1952_v10  ;;  %1397 = vmatprep.subr.mxu1 %v681_v50 }
 0x146   : > { %v2068_v58 = vsel %vm470_vm8, %v560_v27, %v573_v41  ;;  %vm1145_vm8 = vcmp.gt.f32.partialorder %v1811_v1, 0.0 }
 0x147   : > { %1395 = vmatmul.mubr.msk.f32.vlgmr.msra.gmra.mrb[0].mxu1 %vm581_vm9, %v2068_v58 }
 0x148   : > { %1398 = vmatpush3.msra.mxu1 %v681_v50 }
 0x1a1   : > { %v685_v46 = vpop.permute.xlu1 %684 }
 0x1a5   : > { %v813_v61 = vpop.permute.xlu1 %812 }
 0x1a6   : > { %1405 = vmatprep.subr.mxu0 %v813_v61 }
 0x1a7   : > { %1406 = vmatpush3.msra.mxu0 %v813_v61 }
 0x1a9   : > { %v897_v7 = vpop.permute.xlu1 %896 }
 0x1aa   : > { %1410 = vmatprep.subr.mxu0 %v897_v7 }
 0x204   : > { %v1393_v10 = vpop.f32.mrb[0].mxu0 }
 0x205   : > { %v662_v29 = vadd.f32 %v1393_v10, %v1349_v39  ;;  %v656_v49 = vpop.f32.mrb[1].mxu0  ;;  %v981_v10 = vpop.permute.xlu0 %980 }
 0x206   : > { %v657_v21 = vadd.f32 %v1349_v39, %v656_v49 }
 0x207   : > { %v676_v33 = vmax.f32 %v662_v29, 0.0  ;;  %v1010_v29 = vsub.s32 1, %v1949_v62 }
 0x208   : > { %v675_v24 = vmax.f32 %v657_v21, 0.0 }
 0x20a   : > { %1399 = vmatprep.mubr.msk.f32.mxu1 %vm581_vm9, %v675_v24 }
 0x20b   : > { %1400 = vmatmul.mubr.msk.f32.vlgmr.msra.gmra.mrb[2].mxu1 %vm581_vm9, %v676_v33  ;;  %v1024_v33 = vsub.s32 3, %v1949_v62 }
 0x21a   : > { %v1396_v35 = vpop.f32.mrb[0].mxu1 }
 0x21b   : > { %v672_v57 = vadd.f32 %v1396_v35, %v1349_v39  ;;  %v666_v63 = vpop.f32.mrb[1].mxu1  ;;  %v1017_v35 = vsub.s32 2, %v1949_v62 }
 0x21c   : > { %v667_v53 = vadd.f32 %v1349_v39, %v666_v63  ;;  %v1038_v63 = vsub.s32 5, %v1949_v62 }
 0x21d   : > { %v678_v40 = vmax.f32 %v672_v57, 0.0 }
 0x21e   : > { %v677_v59 = vmax.f32 %v667_v53, 0.0  ;;  %v1031_v53 = vsub.s32 4, %v1949_v62 }
 0x220   : > { %1402 = vmatprep.mubr.msk.f32.mxu1 %vm581_vm9, %v677_v59 }
 0x221   : > { %1403 = vmatmul.mubr.msk.f32.gmra.mrb[4].mxu1 %vm581_vm9, %v678_v40 }
 0x2de   : > { %v1401_v8 = vpop.f32.mrb[2].mxu1 }
 0x2df   : > { %v765_v9 = vpop.f32.mrb[3].mxu1  ;;  %v771_v28 = vadd.f32 %v1401_v8, %v685_v46 }
 0x2e0   : > { %v766_v13 = vadd.f32 %v765_v9, %v685_v46 }
 0x2e1   : > { %v1359_v54 = vmul.f32 -1.442695, %v771_v28  ;;  %v1045_v28 = vsub.s32 6, %v1949_v62 }
 0x2e2   : > { %v1358_v16 = vmul.f32 -1.442695, %v766_v13 }
 0x2e4   : > { %1483 = vpow2.f32 %v1358_v16 }
 0x2ee   : > { %v1484_v18 = vpop.eup %1483 }
 0x2ef   : > { %v796_v48 = vadd.f32 1.0, %v1484_v18 }
 0x2f4   : > { %v1404_v17 = vpop.f32.mrb[4].mxu1 }
 0x2f5   : > { %v781_v36 = vadd.f32 %v1404_v17, %v685_v46  ;;  %v775_v42 = vpop.f32.mrb[5].mxu1  ;;  %v1052_v17 = vsub.s32 7, %v1949_v62 }
 0x2f6   : > { %v776_v43 = vadd.f32 %v775_v42, %v685_v46 }
 0x2f7   : > { %v1361_v44 = vmul.f32 -1.442695, %v781_v36 }
 0x2f8   : > { %v1360_v47 = vmul.f32 -1.442695, %v776_v43 }
 0x2f9   : > { %1485 = vpow2.f32 %v1361_v44 }
 0x2fa   : > { %1487 = vpow2.f32 %v1360_v47  ;;  %v994_v47 = vand.u32 2147483647, %v1827_v5 }
 0x2fb   : > { %1489 = vpow2.f32 %v1359_v54  ;;  %v993_v54 = vand.u32 2147483647, %v1816_v2 }
 0x2fc   : > { %1491 = vrcp.f32 %v796_v48 }
 0x303   : > { %v1486_v56 = vpop.eup %1485 }
 0x304   : > { %v1488_v55 = vpop.eup %1487  ;;  %v799_v52 = vadd.f32 1.0, %v1486_v56 }
 0x305   : > { %v798_v15 = vadd.f32 1.0, %v1488_v55  ;;  %v1490_v23 = vpop.eup %1489 }
 0x306   : > { %1493 = vrcp.f32 %v799_v52  ;;  %v797_v51 = vadd.f32 1.0, %v1490_v23  ;;  %v1492_v14 = vpop.eup %1491  ;;  %v995_v52 = vand.u32 2147483647, %v1832_v6 }
 0x307   : > { %1495 = vrcp.f32 %v798_v15  ;;  %v808_v41 = vmul.f32 %v1492_v14, %v2001_v45 }
 0x308   : > { %1497 = vrcp.f32 %v797_v51 }
 0x310   : > { %v1494_v30 = vpop.eup %1493 }
 0x311   : > { %v1496_v60 = vpop.eup %1495  ;;  %v811_v27 = vmul.f32 %v1494_v30, %v2068_v58  ;;  %v998_v30 = vand.u32 2147483647, %v1884_v26 }
 0x312   : > { %v810_v22 = vmul.f32 %v1496_v60, %v2059_v34  ;;  %v1498_v39 = vpop.eup %1497  ;;  %v1003_v34 = vsub.s32 0, %v1949_v62  ;;  %v996_v62 = vand.u32 2147483647, %v1848_v12  ;;  %v997_v60 = vand.u32 2147483647, %v1868_v20 }
 0x313   : > { %v809_v50 = vmul.f32 %v1498_v39, %v2020_v38 }
 0x314   : > { %1407 = vmatprep.mubr.msk.f32.mxu0 %vm581_vm9, %v810_v22 }
 0x315   : > { %1408 = vmatmul.mubr.msk.f32.vlgmr.msra.gmra.mrb[2].mxu0 %vm581_vm9, %v811_v27 }
 0x316   : > { %1411 = vmatpush3.msra.mxu0 %v897_v7  ;;  %1412 = vmatprep.mubr.msk.f32.mxu0 %vm581_vm9, %v808_v41 }
 0x31d   : > { %1413 = vmatmul.mubr.msk.f32.vlgmr.msra.gmra.mrb[2].mxu0 %vm581_vm9, %v809_v50  ;;  %vm1161_vm9 = vcmp.lt.f32.partialorder %v1811_v1, 0.0 }
 0x3f0   : > { %v1414_v58 = vpop.f32.mrb[2].mxu0 }
 0x3f1   : > { %v984_v49 = vadd.f32 %v1414_v58, %v981_v10  ;;  %v971_v21 = vpop.f32.mrb[3].mxu0 }
 0x3f2   : > { %v983_v59 = vadd.f32 %v981_v10, %v971_v21 }
 0x3f3   : > { %v1067_v24 = vrot.slane %v984_v49, %v1010_v29  ;;  %v1060_v45 = vrot.slane %v984_v49, %v1003_v34  ;;  %v1081_v57 = vrot.slane %v984_v49, %v1024_v33  ;;  %v1074_v38 = vrot.slane %v984_v49, %v1017_v35 }
 0x3f4   : > { %v1095_v40 = vrot.slane %v984_v49, %v1038_v63  ;;  %v1088_v46 = vrot.slane %v984_v49, %v1031_v53  ;;  %v1011_v61 = vrot.slane %v983_v59, %v1010_v29  ;;  %v1004_v7 = vrot.slane %v983_v59, %v1003_v34 }
 0x3f5   : > { %1069 = vbcast.lane.b32.xlu0 %v1067_v24, 256  ;;  %1062 = vbcast.lane.b32.xlu1 %v1060_v45, 256  ;;  %v1025_v8 = vrot.slane %v983_v59, %v1024_v33  ;;  %v1018_v9 = vrot.slane %v983_v59, %v1017_v35  ;;  %v1039_v13 = vrot.slane %v983_v59, %v1038_v63  ;;  %v986_v45 = vand.u32 2147483647, %v1819_v3 }
 0x3f6   : > { %v1032_v16 = vrot.slane %v983_v59, %v1031_v53  ;;  %v1053_v36 = vrot.slane %v983_v59, %v1052_v17  ;;  %v1046_v42 = vrot.slane %v983_v59, %v1045_v28  ;;  %v1109_v43 = vrot.slane %v984_v49, %v1052_v17 }
 0x3f7   : > { %v1102_v44 = vrot.slane %v984_v49, %v1045_v28  ;;  %v985_v33 = vand.u32 2147483647, %v1811_v1 }
 0x3f9   : > { %1083 = vbcast.lane.b32.xlu0 %v1081_v57, 256  ;;  %1076 = vbcast.lane.b32.xlu1 %v1074_v38, 256 }
 0x3fd   : > { %1097 = vbcast.lane.b32.xlu0 %v1095_v40, 256  ;;  %1090 = vbcast.lane.b32.xlu1 %v1088_v46, 256 }
 0x401   : > { %1013 = vbcast.lane.b32.xlu0 %v1011_v61, 256  ;;  %1006 = vbcast.lane.b32.xlu1 %v1004_v7, 256 }
 0x405   : > { %1027 = vbcast.lane.b32.xlu0 %v1025_v8, 256  ;;  %1020 = vbcast.lane.b32.xlu1 %v1018_v9, 256  ;;  %v988_v8 = vand.u32 2147483647, %v1824_v4  ;;  %v987_v9 = vand.u32 2147483647, %v1808_v0 }
 0x409   : > { %1041 = vbcast.lane.b32.xlu0 %v1039_v13, 256  ;;  %1034 = vbcast.lane.b32.xlu1 %v1032_v16, 256 }
 0x40d   : > { %1055 = vbcast.lane.b32.xlu0 %v1053_v36, 256  ;;  %1048 = vbcast.lane.b32.xlu1 %v1046_v42, 256 }
 0x411   : > { %1111 = vbcast.lane.b32.xlu0 %v1109_v43, 256  ;;  %1104 = vbcast.lane.b32.xlu1 %v1102_v44, 256 }
 0x467   : > { %v1070_v18 = vpop.permute.xlu0 %1069  ;;  %v1063_v48 = vpop.permute.xlu1 %1062 }
 0x468   : > { %v1122_v56 = vsub.f32 %v994_v47, %v1070_v18  ;;  %v1121_v55 = vsub.f32 %v993_v54, %v1063_v48  ;;  %v990_v18 = vand.u32 2147483647, %v1864_v19  ;;  %v989_v48 = vand.u32 2147483647, %v1844_v11 }
 0x46a   : > { %v1138_v15 = vmax.f32 %v1122_v56, 0.0  ;;  %v1137_v23 = vmax.f32 %v1121_v55, 0.0 }
 0x46b   : > { %v1084_v51 = vpop.permute.xlu0 %1083  ;;  %v1077_v14 = vpop.permute.xlu1 %1076 }
 0x46c   : > { %v1186_v22 = vsub.f32 0.0, %v1138_v15  ;;  %v1185_v27 = vsub.f32 0.0, %v1137_v23  ;;  %v1124_v41 = vsub.f32 %v996_v62, %v1084_v51  ;;  %v1123_v39 = vsub.f32 %v995_v52, %v1077_v14 }
 0x46e   : > { %v1202_v50 = vsel %vm1170_vm11, %v1186_v22, 0.0  ;;  %v1201_v10 = vsel %vm1169_vm13, %v1185_v27, 0.0  ;;  %v1140_v29 = vmax.f32 %v1124_v41, 0.0  ;;  %v1139_v34 = vmax.f32 %v1123_v39, 0.0 }
 0x46f   : > { %v1218_v58 = vsel %vm1154_vm10, %v1138_v15, %v1202_v50  ;;  %v1217_v49 = vsel %vm1153_vm12, %v1137_v23, %v1201_v10  ;;  %v1098_v21 = vpop.permute.xlu0 %1097  ;;  %v1091_v24 = vpop.permute.xlu1 %1090  ;;  %vm1148_vm10 = vcmp.gt.f32.partialorder %v1824_v4, 0.0  ;;  %vm1164_vm11 = vcmp.lt.f32.partialorder %v1824_v4, 0.0 }
 0x470   : > { %1234 = vst [vmem:[%s2119_s5 + $0x48] sm:$0xff] %v1218_v58  ;;  %1233 = vst [vmem:[%s2119_s5 + $0x40] sm:$0xff] %v1217_v49  ;;  %v1188_v35 = vsub.f32 0.0, %v1140_v29  ;;  %v1187_v57 = vsub.f32 0.0, %v1139_v34  ;;  %v1126_v5 = vsub.f32 %v998_v30, %v1098_v21  ;;  %v1125_v38 = vsub.f32 %v997_v60, %v1091_v24 }
 0x471   : > { %vm1147_vm12 = vcmp.gt.f32.partialorder %v1808_v0, 0.0  ;;  %vm1163_vm13 = vcmp.lt.f32.partialorder %v1808_v0, 0.0  ;;  %v992_v22 = vand.u32 2147483647, %v1896_v31  ;;  %v991_v27 = vand.u32 2147483647, %v1880_v25 }
 0x472   : > { %v1204_v2 = vsel %vm1172_vm15, %v1188_v35, 0.0  ;;  %v1203_v63 = vsel %vm1171_vm1, %v1187_v57, 0.0  ;;  %v1142_v53 = vmax.f32 %v1126_v5, 0.0  ;;  %v1141_v59 = vmax.f32 %v1125_v38, 0.0 }
 0x473   : > { %v1220_v40 = vsel %vm1156_vm14, %v1140_v29, %v1204_v2  ;;  %v1219_v46 = vsel %vm1155_vm0, %v1139_v34, %v1203_v63  ;;  %v1014_v61 = vpop.permute.xlu0 %1013  ;;  %v1007_v7 = vpop.permute.xlu1 %1006  ;;  %vm1150_vm14 = vcmp.gt.f32.partialorder %v1864_v19, 0.0  ;;  %vm1166_vm15 = vcmp.lt.f32.partialorder %v1864_v19, 0.0 }
 0x474   : > { %1236 = vst [vmem:[%s2119_s5 + $0x58] sm:$0xff] %v1220_v40  ;;  %1235 = vst [vmem:[%s2119_s5 + $0x50] sm:$0xff] %v1219_v46  ;;  %v1190_v13 = vsub.f32 0.0, %v1142_v53  ;;  %v1189_v16 = vsub.f32 0.0, %v1141_v59  ;;  %v1114_v17 = vsub.f32 %v986_v45, %v1014_v61  ;;  %v1113_v28 = vsub.f32 %v985_v33, %v1007_v7 }
 0x475   : > { %vm1149_vm0 = vcmp.gt.f32.partialorder %v1844_v11, 0.0  ;;  %vm1165_vm1 = vcmp.lt.f32.partialorder %v1844_v11, 0.0  ;;  %v1000_v45 = vand.u32 2147483647, %v1912_v37  ;;  %v999_v33 = vand.u32 2147483647, %v1900_v32 }
 0x476   : > { %v1206_v6 = vsel %vm1174_vm3, %v1190_v13, 0.0  ;;  %v1205_v12 = vsel %vm1173_vm5, %v1189_v16, 0.0  ;;  %v1130_v36 = vmax.f32 %v1114_v17, 0.0  ;;  %v1129_v42 = vmax.f32 %v1113_v28, 0.0 }
 0x477   : > { %v1222_v43 = vsel %vm1158_vm2, %v1142_v53, %v1206_v6  ;;  %v1221_v44 = vsel %vm1157_vm4, %v1141_v59, %v1205_v12  ;;  %v1028_v47 = vpop.permute.xlu0 %1027  ;;  %v1021_v54 = vpop.permute.xlu1 %1020  ;;  %vm1152_vm2 = vcmp.gt.f32.partialorder %v1896_v31, 0.0  ;;  %vm1168_vm3 = vcmp.lt.f32.partialorder %v1896_v31, 0.0 }
 0x478   : > { %1238 = vst [vmem:[%s2119_s5 + $0x68] sm:$0xff] %v1222_v43  ;;  %1237 = vst [vmem:[%s2119_s5 + $0x60] sm:$0xff] %v1221_v44  ;;  %v1178_v56 = vsub.f32 0.0, %v1130_v36  ;;  %v1177_v55 = vsub.f32 0.0, %v1129_v42  ;;  %v1116_v62 = vsub.f32 %v988_v8, %v1028_v47  ;;  %v1115_v52 = vsub.f32 %v987_v9, %v1021_v54 }
 0x479   : > { %vm1151_vm4 = vcmp.gt.f32.partialorder %v1880_v25, 0.0  ;;  %vm1167_vm5 = vcmp.lt.f32.partialorder %v1880_v25, 0.0 }
 0x47a   : > { %v1194_v20 = vsel %vm1162_vm7, %v1178_v56, 0.0  ;;  %v1193_v26 = vsel %vm1161_vm9, %v1177_v55, 0.0  ;;  %v1132_v15 = vmax.f32 %v1116_v62, 0.0  ;;  %v1131_v23 = vmax.f32 %v1115_v52, 0.0 }
 0x47b   : > { %v1210_v51 = vsel %vm1146_vm6, %v1130_v36, %v1194_v20  ;;  %v1209_v14 = vsel %vm1145_vm8, %v1129_v42, %v1193_v26  ;;  %v1042_v30 = vpop.permute.xlu0 %1041  ;;  %v1035_v60 = vpop.permute.xlu1 %1034  ;;  %vm1176_vm6 = vcmp.lt.f32.partialorder %v1912_v37, 0.0  ;;  %vm1175_vm7 = vcmp.lt.f32.partialorder %v1900_v32, 0.0 }
 0x47c   : > { %1226 = vst [vmem:[%s2119_s5 + $0x8] sm:$0xff] %v1210_v51  ;;  %1225 = vst [vmem:[%s2119_s5] sm:$0xff] %v1209_v14  ;;  %v1180_v41 = vsub.f32 0.0, %v1132_v15  ;;  %v1179_v39 = vsub.f32 0.0, %v1131_v23  ;;  %v1118_v50 = vsub.f32 %v990_v18, %v1042_v30  ;;  %v1117_v10 = vsub.f32 %v989_v48, %v1035_v60 }
 0x47d   : > { %vm1160_vm8 = vcmp.gt.f32.partialorder %v1912_v37, 0.0  ;;  %vm1159_vm9 = vcmp.gt.f32.partialorder %v1900_v32, 0.0 }
 0x47e   : > { %v1196_v1 = vsel %vm1164_vm11, %v1180_v41, 0.0  ;;  %v1195_v3 = vsel %vm1163_vm13, %v1179_v39, 0.0  ;;  %v1134_v29 = vmax.f32 %v1118_v50, 0.0  ;;  %v1133_v34 = vmax.f32 %v1117_v10, 0.0 }
 0x47f   : > { %v1212_v58 = vsel %vm1148_vm10, %v1132_v15, %v1196_v1  ;;  %v1211_v49 = vsel %vm1147_vm12, %v1131_v23, %v1195_v3  ;;  %v1056_v21 = vpop.permute.xlu0 %1055  ;;  %v1049_v24 = vpop.permute.xlu1 %1048 }
 0x480   : > { %1228 = vst [vmem:[%s2119_s5 + $0x18] sm:$0xff] %v1212_v58  ;;  %1227 = vst [vmem:[%s2119_s5 + $0x10] sm:$0xff] %v1211_v49  ;;  %v1182_v35 = vsub.f32 0.0, %v1134_v29  ;;  %v1181_v57 = vsub.f32 0.0, %v1133_v34  ;;  %v1120_v5 = vsub.f32 %v992_v22, %v1056_v21  ;;  %v1119_v38 = vsub.f32 %v991_v27, %v1049_v24 }
 0x482   : > { %v1198_v0 = vsel %vm1166_vm15, %v1182_v35, 0.0  ;;  %v1197_v4 = vsel %vm1165_vm1, %v1181_v57, 0.0  ;;  %v1136_v2 = vmax.f32 %v1120_v5, 0.0  ;;  %v1135_v63 = vmax.f32 %v1119_v38, 0.0 }
 0x483   : > { %v1214_v53 = vsel %vm1150_vm14, %v1134_v29, %v1198_v0  ;;  %v1213_v59 = vsel %vm1149_vm0, %v1133_v34, %v1197_v4  ;;  %v1112_v40 = vpop.permute.xlu0 %1111  ;;  %v1105_v46 = vpop.permute.xlu1 %1104 }
 0x484   : > { %1230 = vst [vmem:[%s2119_s5 + $0x28] sm:$0xff] %v1214_v53  ;;  %1229 = vst [vmem:[%s2119_s5 + $0x20] sm:$0xff] %v1213_v59  ;;  %v1184_v61 = vsub.f32 0.0, %v1136_v2  ;;  %v1183_v7 = vsub.f32 0.0, %v1135_v63  ;;  %v1128_v8 = vsub.f32 %v1000_v45, %v1112_v40  ;;  %v1127_v19 = vsub.f32 %v999_v33, %v1105_v46 }
 0x486   : > { %v1200_v11 = vsel %vm1168_vm3, %v1184_v61, 0.0  ;;  %v1199_v9 = vsel %vm1167_vm5, %v1183_v7, 0.0  ;;  %v1144_v13 = vmax.f32 %v1128_v8, 0.0  ;;  %v1143_v16 = vmax.f32 %v1127_v19, 0.0 }
 0x487   : > { %v1216_v17 = vsel %vm1152_vm2, %v1136_v2, %v1200_v11  ;;  %v1215_v28 = vsel %vm1151_vm4, %v1135_v63, %v1199_v9 }
 0x488   : > { %1232 = vst [vmem:[%s2119_s5 + $0x38] sm:$0xff] %v1216_v17  ;;  %1231 = vst [vmem:[%s2119_s5 + $0x30] sm:$0xff] %v1215_v28  ;;  %v1192_v6 = vsub.f32 0.0, %v1144_v13  ;;  %v1191_v31 = vsub.f32 0.0, %v1143_v16 }
 0x48a   : > { %v1208_v25 = vsel %vm1176_vm6, %v1192_v6, 0.0  ;;  %v1207_v12 = vsel %vm1175_vm7, %v1191_v31, 0.0 }
 0x48b   : > { %v1224_v36 = vsel %vm1160_vm8, %v1144_v13, %v1208_v25  ;;  %v1223_v42 = vsel %vm1159_vm9, %v1143_v16, %v1207_v12 }
 0x48c   : > { %1240 = vst [vmem:[%s2119_s5 + $0x78] sm:$0xff] %v1224_v36  ;;  %1239 = vst [vmem:[%s2119_s5 + $0x70] sm:$0xff] %v1223_v42 }
 0x48d   : > { %1570 = shalt.err (!%p1567_p7)
}
 0x48e   : > { %s1571_s25 = scalar_lea.hbm %s2218_s3, 2048  ;;  %s1575_s30 = scalar_lea.hbm %s2267_s2, 8192 }
 0x48f   : > { %p1572_p9 = scmp.ne.s32.totalorder %s2218_s3, %s1571_s25  ;;  %p1576_p5 = scmp.lt.u32.totalorder %s2218_s3, %s2267_s2 }
 0x490   : > { %p1577_p10 = scmp.lt.u32.totalorder %s1575_s30, %s1571_s25  ;;  %p1579_p4 = scmp.lt.u32.totalorder %s1571_s25, %s2218_s3 }
 0x491   : > { %p1573_p1 = pnand %p1572_p9, %p1740_p12 }
 0x492   : > { %p1578_p2 = por %p1577_p10, %p1576_p5 }
 0x493   : > { %p1574_p0 = pneg %p1573_p1 }
 0x494   : > { %p1580_p6 = por %p1579_p4, %p1578_p2 }
 0x496   : > { %p1581_p8 = pnand %p1580_p6, %p1574_p0 }
 0x498   : > { %1584 = shalt.err (!%p1581_p8)
}
 0x499   : > { %s1637_s17 = smov 128   ;;  %s1638_s4 = smov 8  }
 0x49a   : > { %1425 = dma.vmem_to_hbm [thread:$0]  (%p1740_p12), %s2220_s22, 2048, %s2218_s3, %s1242_s6, %s1637_s17, %s1637_s17, %s1638_s4  }
 0x49b PF: > { %p1442_p11 = scmp.ge.s32.totalorder %s1627_s12, 2  ;;  %s1270_s5 = sand.u32 1, %s1615_s9  }
 0x49c   : > { %p2282_p13 = scmp.ne.s32.totalorder %s2272_s16, 0  ;;  %s1271_s27 = scalar_lea.sflag [#allocation4], %s1270_s5 }
 0x49e   : > { %p1436_p3 = pnand %p1442_p11, %p2282_p13 }
 0x4a0   : > { %1610 = dma.done.wait (!%p1436_p3), %s1271_s27, 2048  }
 0x4a1   : > { %1612 = vsyncadd (!%p1436_p3), %s1271_s27, 4294965248  ;;  %p16_p7 = scmp.ge.s32.totalorder %s1707_s21, 6   ;;  %s2283_s9 = smov %s1619_s10 }
 0x4a2   : > { %s2284_s10 = smov %s1623_s11  ;;  %s2285_s11 = smov %s1736_s8 }
 0x4a3   : > { %s2286_s12 = smov %s1707_s21  ;;  %18 = sbr.rel (!%p16_p7) target bundleno = 6 (0x6), region = 77 }
 0x4aa   :  { %1276 = vsyncpa [#allocation3], 1 }
 0x4ab   :  { %1278 = vsyncpa [#allocation3 + $0x1], 1 }
 0x4ac   :  { %1279 = vsyncpa [#allocation6], 1 }
 0x4ad   :  { %1280 = vsyncpa [#allocation4], 1 }
 0x4ae   :  { %1282 = vsyncpa [#allocation4 + $0x1], 1 }

</bundles_post_ra>
